<compile_context>
chip_gen: v7x
topology: tpu7x:2x2x1
jax: 0.10.0
libtpu: 0.0.40
codegen_flags: <defaults>
</compile_context>

<pallas_src>
import functools

import jax
import jax.numpy as jnp
from jax import lax
from jax.experimental import pallas as pl
from jax.experimental.pallas import tpu as pltpu

_LANES = 128


def _focal_dice_partials_kernel(x_ref, t_ref, o_st, o_spt, o_at, *,
                                alpha, n_elems, block_rows, chunk_rows,
                                num_chunks, blocks_per_p, needs_mask):
    """Accumulates three (8,128) partial sums directly into the output refs.

      o_st  += sigmoid(x) * t        (dice intersection)
      o_spt += sigmoid(x) + t        (dice denominator; s and t fused)
      o_at  += at                    (alpha / 1-alpha / 0 focal weight)
    """
    p = pl.program_id(0)
    k = pl.program_id(1)

    @pl.when(k == 0)
    def _():
        o_st[...] = jnp.zeros_like(o_st)
        o_spt[...] = jnp.zeros_like(o_spt)
        o_at[...] = jnp.zeros_like(o_at)

    block_elems = block_rows * _LANES
    chunk_elems = chunk_rows * _LANES
    groups = chunk_rows // 8

    def chunk_body(c, apply_mask):
        if isinstance(c, int):
            start = c * chunk_rows
        else:
            start = pl.multiple_of(c * chunk_rows, chunk_rows)
        x = x_ref[pl.ds(start, chunk_rows), :].astype(jnp.float32)
        t = t_ref[pl.ds(start, chunk_rows), :].astype(jnp.float32)

        # sigmoid(x) == 0.5 * tanh(0.5*x) + 0.5 : one EUP transcendental/vreg.
        s = 0.5 * jnp.tanh(0.5 * x) + 0.5
        # at = alpha where t==1, (1-alpha) where t==0, else 0 -- keeps the
        # PyTorch where/where semantics for non-binary targets.
        at = jnp.where(t == 1.0, jnp.float32(alpha),
                       jnp.where(t == 0.0, jnp.float32(1.0 - alpha),
                                 jnp.float32(0.0)))
        st = s * t
        spt = s + t

        if apply_mask:
            # Only the globally-last block reaches this path.  Zero out every
            # accumulated quantity past the true element count (covers both
            # the <128-lane pad and unspecified rows of a ragged edge block).
            # Note: flat indices assumed to fit in int32.
            base = (p * blocks_per_p + k) * block_elems + c * chunk_elems
            ridx = lax.broadcasted_iota(jnp.int32, (chunk_rows, _LANES), 0)
            lidx = lax.broadcasted_iota(jnp.int32, (chunk_rows, _LANES), 1)
            valid = (base + ridx * _LANES + lidx) < n_elems
            zero = jnp.float32(0.0)
            st = jnp.where(valid, st, zero)
            spt = jnp.where(valid, spt, zero)
            at = jnp.where(valid, at, zero)

        # (chunk_rows, 128) -> (8, 128): vreg-to-vreg VALU adds only.
        o_st[...] += st.reshape(groups, 8, _LANES).sum(axis=0)
        o_spt[...] += spt.reshape(groups, 8, _LANES).sum(axis=0)
        o_at[...] += at.reshape(groups, 8, _LANES).sum(axis=0)

    def run(apply_mask):
        if num_chunks == 1:
            chunk_body(0, apply_mask)
        else:
            lax.fori_loop(0, num_chunks,
                          lambda c, carry: chunk_body(c, apply_mask), None)

    if needs_mask:
        is_last = jnp.logical_and(p == pl.num_programs(0) - 1,
                                  k == pl.num_programs(1) - 1)
        pl.when(is_last)(lambda: run(True))
        pl.when(jnp.logical_not(is_last))(lambda: run(False))
    else:
        run(False)


def _round_up(x, m):
    return ((x + m - 1) // m) * m


def focal_dice_loss(inp, target, *, alpha=0.25, gamma=2.0, smooth=1.0,
                    max_block_rows=4096):
    """Pallas TPU implementation of FocalDiceLoss.forward. Returns f32 scalar."""
    assert inp.shape == target.shape
    n = int(inp.size)
    rows = pl.cdiv(n, _LANES)
    max_block_rows = max(128, (int(max_block_rows) // 128) * 128)

    # Tile policy: big lane-dense streaming blocks (2 MiB/input at the 4096-row
    # default), reduced in 64-row chunks in-kernel so temporaries stay small.
    if rows <= 128:
        block_rows = _round_up(rows, 8)
        chunk_rows = block_rows
    else:
        block_rows = min(max_block_rows, (rows // 128) * 128)
        chunk_rows = 64
    num_chunks = block_rows // chunk_rows
    num_blocks = pl.cdiv(rows, block_rows)

    # Split the streaming reduction across both TensorCores (v7x) when the
    # block count divides evenly; serial (and harmless) on 1-TC chips.
    # TODO(synk): handle odd block counts with an uneven per-core split.
    num_p = 2 if (num_blocks >= 2 and num_blocks % 2 == 0) else 1
    blocks_per_p = num_blocks // num_p

    host_rows = max(rows, block_rows)           # > rows only for tiny inputs
    padded = host_rows * _LANES
    needs_mask = (num_blocks * block_rows * _LANES) != n

    def _prep(a):
        a = a.reshape(-1)
        if padded != n:
            # Only hit when numel isn't lane-aligned (or input is tiny).
            # TODO(synk): a 1-D ragged BlockSpec would avoid this copy too.
            a = jnp.pad(a, (0, padded - n))
        return a.reshape(host_rows, _LANES)

    x2 = _prep(inp)
    t2 = _prep(target)

    kernel = functools.partial(
        _focal_dice_partials_kernel,
        alpha=float(alpha), n_elems=n, block_rows=int(block_rows),
        chunk_rows=int(chunk_rows), num_chunks=int(num_chunks),
        blocks_per_p=int(blocks_per_p), needs_mask=bool(needs_mask))

    in_map = lambda p, k: (p * blocks_per_p + k, 0)
    out_map = lambda p, k: (p, 0)

    part_st, part_spt, part_at = pl.pallas_call(
        kernel,
        out_shape=(jax.ShapeDtypeStruct((num_p * 8, _LANES), jnp.float32),) * 3,
        grid_spec=pltpu.PrefetchScalarGridSpec(
            num_scalar_prefetch=0,
            grid=(num_p, blocks_per_p),
            in_specs=[pl.BlockSpec((block_rows, _LANES), in_map),
                      pl.BlockSpec((block_rows, _LANES), in_map)],
            out_specs=[pl.BlockSpec((8, _LANES), out_map)] * 3,
        ),
        compiler_params=pltpu.CompilerParams(
            dimension_semantics=("parallel", "arbitrary"),
            vmem_limit_bytes=32 * 1024 * 1024),
    )(x2, t2)

    # Scalar finalize (~10 flops) in plain JAX on the partial sums.
    sum_st = jnp.sum(part_st)
    sum_spt = jnp.sum(part_spt)
    sum_at = jnp.sum(part_at)
    dice_loss = 1.0 - (2.0 * sum_st + smooth) / (sum_spt + smooth)
    pt = jnp.exp(-dice_loss)
    # mean(at * (1-pt)^gamma * dice) == mean(at) * (1-pt)^gamma * dice because
    # pt and dice are scalars.
    return (sum_at / jnp.float32(n)) * (1.0 - pt) ** gamma * dice_loss


def _reference(inp, target, alpha=0.25, gamma=2.0, smooth=1.0):
    """Pure-JAX reference mirroring the PyTorch forward exactly."""
    s = jax.nn.sigmoid(inp.astype(jnp.float32))
    t = target.astype(jnp.float32)
    inter = jnp.sum(s * t)
    dice = 1.0 - (2.0 * inter + smooth) / (jnp.sum(s) + jnp.sum(t) + smooth)
    at = jnp.where(t == 1.0, alpha, jnp.where(t == 0.0, 1.0 - alpha, 0.0))
    pt = jnp.exp(-dice)
    return jnp.mean(at * (1.0 - pt) ** gamma * dice)


if __name__ == "__main__":
    # FocalDiceLoss has no learnable weights; alpha/gamma are fixed hyperparams.
    alpha, gamma, smooth = 0.25, 2.0, 1.0

    key = jax.random.PRNGKey(0)
    k_logits, k_target = jax.random.split(key)
    shape = (2, 4, 16, 16)                                   # NCHW, small
    logits = jax.random.normal(k_logits, shape, dtype=jnp.float32)
    target = jax.random.bernoulli(k_target, 0.5, shape).astype(jnp.float32)

    loss = focal_dice_loss(logits, target, alpha=alpha, gamma=gamma,
                           smooth=smooth)
    loss = jax.block_until_ready(loss)

    ref = jax.block_until_ready(_reference(logits, target, alpha, gamma, smooth))
    assert jnp.allclose(loss, ref, rtol=1e-4, atol=1e-6), (loss, ref)

    print("KERNEL_OK")
</pallas_src>

<mosaic_0001>
module attributes {stable_mosaic.version = 11 : i64} {
  func.func @_focal_dice_partials_kernel(%arg0: i32, %arg1: i32, %arg2: memref<16x128xf32, #tpu.memory_space<vmem>>, %arg3: memref<16x128xf32, #tpu.memory_space<vmem>>, %arg4: memref<8x128xf32, #tpu.memory_space<vmem>>, %arg5: memref<8x128xf32, #tpu.memory_space<vmem>>, %arg6: memref<8x128xf32, #tpu.memory_space<vmem>>) attributes {dimension_semantics = [#tpu.dimension_semantics<parallel>, #tpu.dimension_semantics<arbitrary>], iteration_bounds = array<i64: 1, 1>, scalar_prefetch = 0 : i64, scratch_operands = 0 : i64, tpu.core_type = #tpu.core_type<tc>, window_params = [{transform_indices = @transform_0, window_bounds = array<i64: 16, 128>}, {transform_indices = @transform_1, window_bounds = array<i64: 16, 128>}, {transform_indices = @transform_2, window_bounds = array<i64: 8, 128>}, {transform_indices = @transform_3, window_bounds = array<i64: 8, 128>}, {transform_indices = @transform_4, window_bounds = array<i64: 8, 128>}]} {
    %c0_i32 = arith.constant 0 : i32
    %0 = arith.cmpi eq, %arg1, %c0_i32 : i32
    %1 = arith.extui %0 : i1 to i32
    %c0_i32_0 = arith.constant 0 : i32
    %2 = arith.cmpi ne, %1, %c0_i32_0 : i32
    scf.if %2 {
      %cst_26 = arith.constant 0.000000e+00 : f32
      %38 = vector.broadcast %cst_26 : f32 to vector<8x128xf32>
      %c0_27 = arith.constant 0 : index
      %c0_28 = arith.constant 0 : index
      %39 = vector.load %arg4[%c0_27, %c0_28] : memref<8x128xf32, #tpu.memory_space<vmem>>, vector<8x128xf32>
      tpu.vector_store %arg4[%c0_27, %c0_28], %38 {strides = array<i32>} : memref<8x128xf32, #tpu.memory_space<vmem>>, vector<8x128xf32>,
      %cst_29 = arith.constant 0.000000e+00 : f32
      %40 = vector.broadcast %cst_29 : f32 to vector<8x128xf32>
      %c0_30 = arith.constant 0 : index
      %c0_31 = arith.constant 0 : index
      %41 = vector.load %arg5[%c0_30, %c0_31] : memref<8x128xf32, #tpu.memory_space<vmem>>, vector<8x128xf32>
      tpu.vector_store %arg5[%c0_30, %c0_31], %40 {strides = array<i32>} : memref<8x128xf32, #tpu.memory_space<vmem>>, vector<8x128xf32>,
      %cst_32 = arith.constant 0.000000e+00 : f32
      %42 = vector.broadcast %cst_32 : f32 to vector<8x128xf32>
      %c0_33 = arith.constant 0 : index
      %c0_34 = arith.constant 0 : index
      %43 = vector.load %arg6[%c0_33, %c0_34] : memref<8x128xf32, #tpu.memory_space<vmem>>, vector<8x128xf32>
      tpu.vector_store %arg6[%c0_33, %c0_34], %42 {strides = array<i32>} : memref<8x128xf32, #tpu.memory_space<vmem>>, vector<8x128xf32>,
    } else {
    }
    %c0 = arith.constant 0 : index
    %c0_1 = arith.constant 0 : index
    %3 = vector.load %arg2[%c0, %c0_1] : memref<16x128xf32, #tpu.memory_space<vmem>>, vector<16x128xf32>
    %c0_2 = arith.constant 0 : index
    %c0_3 = arith.constant 0 : index
    %4 = vector.load %arg3[%c0_2, %c0_3] : memref<16x128xf32, #tpu.memory_space<vmem>>, vector<16x128xf32>
    %cst = arith.constant 5.000000e-01 : f32
    %5 = vector.broadcast %cst : f32 to vector<16x128xf32>
    %6 = arith.mulf %5, %3 : vector<16x128xf32>
    %7 = math.tanh %6 : vector<16x128xf32>
    %cst_4 = arith.constant 5.000000e-01 : f32
    %8 = vector.broadcast %cst_4 : f32 to vector<16x128xf32>
    %9 = arith.mulf %8, %7 : vector<16x128xf32>
    %cst_5 = arith.constant 5.000000e-01 : f32
    %10 = vector.broadcast %cst_5 : f32 to vector<16x128xf32>
    %11 = arith.addf %9, %10 : vector<16x128xf32>
    %cst_6 = arith.constant 1.000000e+00 : f32
    %12 = vector.broadcast %cst_6 : f32 to vector<16x128xf32>
    %13 = arith.cmpf oeq, %4, %12 : vector<16x128xf32>
    %cst_7 = arith.constant 0.000000e+00 : f32
    %14 = vector.broadcast %cst_7 : f32 to vector<16x128xf32>
    %15 = arith.cmpf oeq, %4, %14 : vector<16x128xf32>
    %cst_8 = arith.constant 7.500000e-01 : f32
    %cst_9 = arith.constant 0.000000e+00 : f32
    %16 = vector.broadcast %cst_8 : f32 to vector<16x128xf32>
    %17 = vector.broadcast %cst_9 : f32 to vector<16x128xf32>
    %18 = arith.select %15, %16, %17 : vector<16x128xi1>, vector<16x128xf32>
    %cst_10 = arith.constant 2.500000e-01 : f32
    %19 = vector.broadcast %cst_10 : f32 to vector<16x128xf32>
    %20 = arith.select %13, %19, %18 : vector<16x128xi1>, vector<16x128xf32>
    %21 = arith.mulf %11, %4 : vector<16x128xf32>
    %22 = arith.addf %11, %4 : vector<16x128xf32>
    %c0_11 = arith.constant 0 : index
    %c0_12 = arith.constant 0 : index
    %23 = vector.load %arg4[%c0_11, %c0_12] : memref<8x128xf32, #tpu.memory_space<vmem>>, vector<8x128xf32>
    %24 = vector.shape_cast %21 : vector<16x128xf32> to vector<2x8x128xf32>
    %cst_13 = arith.constant dense<0.000000e+00> : vector<8x128xf32>
    %25 = vector.multi_reduction <add>, %24, %cst_13 [0] : vector<2x8x128xf32> to vector<8x128xf32>
    %26 = arith.addf %23, %25 : vector<8x128xf32>
    %c0_14 = arith.constant 0 : index
    %c0_15 = arith.constant 0 : index
    %27 = vector.load %arg4[%c0_14, %c0_15] : memref<8x128xf32, #tpu.memory_space<vmem>>, vector<8x128xf32>
    tpu.vector_store %arg4[%c0_14, %c0_15], %26 {strides = array<i32>} : memref<8x128xf32, #tpu.memory_space<vmem>>, vector<8x128xf32>,
    %c0_16 = arith.constant 0 : index
    %c0_17 = arith.constant 0 : index
    %28 = vector.load %arg5[%c0_16, %c0_17] : memref<8x128xf32, #tpu.memory_space<vmem>>, vector<8x128xf32>
    %29 = vector.shape_cast %22 : vector<16x128xf32> to vector<2x8x128xf32>
    %cst_18 = arith.constant dense<0.000000e+00> : vector<8x128xf32>
    %30 = vector.multi_reduction <add>, %29, %cst_18 [0] : vector<2x8x128xf32> to vector<8x128xf32>
    %31 = arith.addf %28, %30 : vector<8x128xf32>
    %c0_19 = arith.constant 0 : index
    %c0_20 = arith.constant 0 : index
    %32 = vector.load %arg5[%c0_19, %c0_20] : memref<8x128xf32, #tpu.memory_space<vmem>>, vector<8x128xf32>
    tpu.vector_store %arg5[%c0_19, %c0_20], %31 {strides = array<i32>} : memref<8x128xf32, #tpu.memory_space<vmem>>, vector<8x128xf32>,
    %c0_21 = arith.constant 0 : index
    %c0_22 = arith.constant 0 : index
    %33 = vector.load %arg6[%c0_21, %c0_22] : memref<8x128xf32, #tpu.memory_space<vmem>>, vector<8x128xf32>
    %34 = vector.shape_cast %20 : vector<16x128xf32> to vector<2x8x128xf32>
    %cst_23 = arith.constant dense<0.000000e+00> : vector<8x128xf32>
    %35 = vector.multi_reduction <add>, %34, %cst_23 [0] : vector<2x8x128xf32> to vector<8x128xf32>
    %36 = arith.addf %33, %35 : vector<8x128xf32>
    %c0_24 = arith.constant 0 : index
    %c0_25 = arith.constant 0 : index
    %37 = vector.load %arg6[%c0_24, %c0_25] : memref<8x128xf32, #tpu.memory_space<vmem>>, vector<8x128xf32>
    tpu.vector_store %arg6[%c0_24, %c0_25], %36 {strides = array<i32>} : memref<8x128xf32, #tpu.memory_space<vmem>>, vector<8x128xf32>,
    return
  }
  func.func @transform_0(%arg0: i32, %arg1: i32) -> (i32, i32) {
    %c1_i32 = arith.constant 1 : i32
    %0 = arith.muli %arg0, %c1_i32 : i32
    %1 = arith.addi %0, %arg1 : i32
    %c0_i32 = arith.constant 0 : i32
    %c0_i32_0 = arith.constant 0 : i32
    return %1, %c0_i32 : i32, i32
  }
  func.func @transform_1(%arg0: i32, %arg1: i32) -> (i32, i32) {
    %c1_i32 = arith.constant 1 : i32
    %0 = arith.muli %arg0, %c1_i32 : i32
    %1 = arith.addi %0, %arg1 : i32
    %c0_i32 = arith.constant 0 : i32
    %c0_i32_0 = arith.constant 0 : i32
    return %1, %c0_i32 : i32, i32
  }
  func.func @transform_2(%arg0: i32, %arg1: i32) -> (i32, i32) {
    %c0_i32 = arith.constant 0 : i32
    %c0_i32_0 = arith.constant 0 : i32
    return %arg0, %c0_i32 : i32, i32
  }
  func.func @transform_3(%arg0: i32, %arg1: i32) -> (i32, i32) {
    %c0_i32 = arith.constant 0 : i32
    %c0_i32_0 = arith.constant 0 : i32
    return %arg0, %c0_i32 : i32, i32
  }
  func.func @transform_4(%arg0: i32, %arg1: i32) -> (i32, i32) {
    %c0_i32 = arith.constant 0 : i32
    %c0_i32_0 = arith.constant 0 : i32
    return %arg0, %c0_i32 : i32, i32
  }
}

</mosaic_0001>

<bundles_post_ra>
// kernel: tpu_custom_call.1
= control target key start
LH: loop header
LB: loop body
LE: loop exit
PB: predicated region body
PF: predicated region fallthrough
CT: control target
= control target key end

     0   :  { %10 = vsyncpa [#allocation3], 0  ;;  %s379_s0 = inlined_call_operand.hbm [shape: f32[16,128], index: 0, kind: input, shape index: {}]   ;;  %s380_s1 = inlined_call_operand.hbm [shape: f32[16,128], index: 1, kind: input, shape index: {}]   ;;  %s381_s2 = inlined_call_operand.hbm [shape: f32[8,128], index: 2, kind: output, shape index: {0}]   ;;  %s382_s3 = inlined_call_operand.hbm [shape: f32[8,128], index: 3, kind: output, shape index: {1}]   ;;  %s383_s4 = inlined_call_operand.hbm [shape: f32[8,128], index: 4, kind: output, shape index: {2}]  }
   0x1   :  { %11 = vsyncpa [#allocation6], 0 }
   0x2   :  { %12 = vsyncpa [#allocation4], 0 }
   0x3   :  { %13 = vsyncpa [#allocation9], 0  ;;  %s272_s15 = smov [#allocation2]   ;;  %s154_s19 = scalar_lea.hbm %s379_s0, 256 }
   0x4   :  { %s23_s16 = sshll.u32 %s272_s15, 4  ;;  %p155_p0 = scmp.ne.s32.totalorder %s379_s0, %s154_s19  ;;  %s24_s16 = int_to_ptr.vmem [resolvable:$true] %s23_s16 }
   0x5   :  { %p158_p1 = scmp.lt.u32.totalorder %s154_s19, %s379_s0 }
   0x7   :  { %p160_p2 = pnand %p158_p1, %p155_p0 }
   0x9   :  { %163 = shalt.err (!%p160_p2)
}
   0xa   :  { %s164_s24 = scalar_lea.vmem %s24_s16, 256  ;;  %p169_p4 = scmp.lt.s32.totalorder %s24_s16, %s24_s16 }
   0xb   :  { %p165_p3 = scmp.ne.s32.totalorder %s24_s16, %s164_s24  ;;  %p170_p5 = scmp.lt.s32.totalorder %s164_s24, %s164_s24 }
   0xd   :  { %p171_p6 = por %p170_p5, %p169_p4 }
   0xf   :  { %p172_p7 = pnand %p171_p6, %p165_p3 }
  0x11   :  { %175 = shalt.err (!%p172_p7)
}
  0x12   :  { %s273_s25 = smov 128   ;;  %s274_s26 = smov 8  }
  0x13   :  { %29 = dma.hbm_to_vmem [thread:$0]  %s379_s0, 256, %s24_s16, [#allocation3], %s273_s25, %s273_s25, %s274_s26  }
  0x14   :  { %s275_s29 = smov [#allocation5]   ;;  %s176_s7 = scalar_lea.hbm %s380_s1, 256 }
  0x15   :  { %s39_s30 = sshll.u32 %s275_s29, 4  ;;  %p177_p8 = scmp.ne.s32.totalorder %s380_s1, %s176_s7  ;;  %s40_s30 = int_to_ptr.vmem [resolvable:$true] %s39_s30 }
  0x16   :  { %p180_p9 = scmp.lt.u32.totalorder %s176_s7, %s380_s1 }
  0x18   :  { %p182_p10 = pnand %p180_p9, %p177_p8 }
  0x1a   :  { %185 = shalt.err (!%p182_p10)
}
  0x1b   :  { %s186_s12 = scalar_lea.vmem %s40_s30, 256  ;;  %p191_p12 = scmp.lt.s32.totalorder %s40_s30, %s40_s30 }
  0x1c   :  { %p187_p11 = scmp.ne.s32.totalorder %s40_s30, %s186_s12  ;;  %p192_p13 = scmp.lt.s32.totalorder %s186_s12, %s186_s12 }
  0x1e   :  { %p193_p0 = por %p192_p13, %p191_p12 }
  0x20   :  { %p194_p1 = pnand %p193_p0, %p187_p11 }
  0x22   :  { %197 = shalt.err (!%p194_p1)
}
  0x23   :  { %45 = dma.hbm_to_vmem [thread:$0]  %s380_s1, 256, %s40_s30, [#allocation6], %s273_s25, %s273_s25, %s274_s26  }
  0x24   :  { %264 = dma.done.wait [#allocation3], 256  }
  0x25   :  { %265 = vsyncadd [#allocation3], 4294967040 }
  0x26   :  { %266 = dma.done.wait [#allocation6], 256  }
  0x27   :  { %267 = vsyncadd [#allocation6], 4294967040  ;;  %v63_v0 = vld [vmem:[#allocation2] sm:$0xff]  ;;  %v64_v1 = vld [vmem:[#allocation2 + $0x8] sm:$0xff]  ;;  %v276_v6 = vmov 0.0   ;;  %s277_s1 = smov [#allocation8]  }
  0x28   :  { %v65_v2 = vld [vmem:[#allocation5] sm:$0xff]  ;;  %v66_v3 = vld [vmem:[#allocation5 + $0x8] sm:$0xff]  ;;  %v67_v4 = vmul.f32 0.5, %v63_v0  ;;  %v68_v5 = vmul.f32 0.5, %v64_v1  ;;  %s115_s14 = sshll.u32 %s277_s1, 4  ;;  %s278_s15 = smov [#allocation7]   ;;  %s116_s14 = int_to_ptr.vmem [resolvable:$true] %s115_s14 }
  0x29   :  { %vm75_vm0 = vcmp.eq.f32.partialorder %v65_v2, 1.0  ;;  %vm77_vm1 = vcmp.eq.f32.partialorder %v65_v2, 0.0  ;;  %vm76_vm2 = vcmp.eq.f32.partialorder %v66_v3, 1.0  ;;  %vm78_vm3 = vcmp.eq.f32.partialorder %v66_v3, 0.0  ;;  %s105_s16 = sshll.u32 %s278_s15, 4  ;;  %s279_s17 = smov [#allocation10]   ;;  %s329_s16 = int_to_ptr.vmem [resolvable:$true] %s105_s16 }
  0x2a   :  { %v79_v7 = vsel %vm77_vm1, 0.75, %v276_v6  ;;  %150 = vtanh.f32 %v67_v4  ;;  %v80_v8 = vsel %vm78_vm3, 0.75, %v276_v6  ;;  %s125_s18 = sshll.u32 %s279_s17, 4  ;;  %s198_s19 = scalar_lea.vmem %s116_s14, 128  ;;  %s331_s18 = int_to_ptr.vmem [resolvable:$true] %s125_s18 }
  0x2b   :  { %v81_v9 = vsel %vm75_vm0, 0.25, %v79_v7  ;;  %152 = vtanh.f32 %v68_v5  ;;  %v82_v10 = vsel %vm76_vm2, 0.25, %v80_v8  ;;  %p199_p2 = scmp.ne.s32.totalorder %s116_s14, %s198_s19  ;;  %p203_p3 = scmp.lt.s32.totalorder %s116_s14, %s116_s14 }
  0x2c   :  { %v96_v11 = vadd.f32 %v82_v10, %v81_v9  ;;  %p204_p4 = scmp.lt.s32.totalorder %s198_s19, %s198_s19 }
  0x2e   :  { %98 = vst [vmem:[#allocation10] sm:$0xff] %v96_v11  ;;  %p205_p5 = por %p204_p4, %p203_p3 }
  0x30   :  { %p206_p6 = pnand %p205_p5, %p199_p2 }
  0x34   :  { %v151_v12 = vpop.eup %150 }
  0x35   :  { %v153_v13 = vpop.eup %152  ;;  %v71_v14 = vmul.f32 0.5, %v151_v12 }
  0x36   :  { %v72_v15 = vmul.f32 0.5, %v153_v13 }
  0x37   :  { %v73_v16 = vadd.f32 0.5, %v71_v14 }
  0x38   :  { %v74_v17 = vadd.f32 0.5, %v72_v15 }
  0x39   :  { %v85_v18 = vadd.f32 %v73_v16, %v65_v2  ;;  %v83_v19 = vmul.f32 %v73_v16, %v65_v2 }
  0x3a   :  { %v86_v20 = vadd.f32 %v74_v17, %v66_v3  ;;  %v84_v21 = vmul.f32 %v74_v17, %v66_v3 }
  0x3c   :  { %v92_v22 = vadd.f32 %v86_v20, %v85_v18  ;;  %v88_v23 = vadd.f32 %v84_v21, %v83_v19 }
  0x3e   :  { %94 = vst [vmem:[#allocation8] sm:$0xff] %v92_v22  ;;  %90 = vst [vmem:[#allocation7] sm:$0xff] %v88_v23 }
  0x3f   :  { %209 = shalt.err (!%p206_p6)
}
  0x40   :  { %s210_s22 = scalar_lea.hbm %s382_s3, 128 }
  0x41   :  { %p211_p7 = scmp.ne.s32.totalorder %s382_s3, %s210_s22  ;;  %p214_p8 = scmp.lt.u32.totalorder %s210_s22, %s382_s3 }
  0x43   :  { %p216_p9 = pnand %p214_p8, %p211_p7 }
  0x45   :  { %219 = shalt.err (!%p216_p9)
}
  0x46   :  { %118 = dma.vmem_to_hbm [thread:$0]  %s116_s14, 128, %s382_s3, [#allocation9]  }
  0x47   :  { %s220_s29 = scalar_lea.vmem %s329_s16, 128  ;;  %p225_p11 = scmp.lt.s32.totalorder %s329_s16, %s329_s16 }
  0x48   :  { %p221_p10 = scmp.ne.s32.totalorder %s329_s16, %s220_s29  ;;  %p226_p12 = scmp.lt.s32.totalorder %s220_s29, %s220_s29 }
  0x4a   :  { %p227_p13 = por %p226_p12, %p225_p11 }
  0x4c   :  { %p228_p0 = pnand %p227_p13, %p221_p10 }
  0x4e   :  { %231 = shalt.err (!%p228_p0)
}
  0x4f   :  { %s232_s6 = scalar_lea.hbm %s381_s2, 128 }
  0x50   :  { %p233_p1 = scmp.ne.s32.totalorder %s381_s2, %s232_s6  ;;  %p236_p2 = scmp.lt.u32.totalorder %s232_s6, %s381_s2 }
  0x52   :  { %p238_p3 = pnand %p236_p2, %p233_p1 }
  0x54   :  { %241 = shalt.err (!%p238_p3)
}
  0x55   :  { %108 = dma.vmem_to_hbm [thread:$0]  %s329_s16, 128, %s381_s2, [#allocation4]  }
  0x56   :  { %s242_s12 = scalar_lea.vmem %s331_s18, 128  ;;  %p247_p5 = scmp.lt.s32.totalorder %s331_s18, %s331_s18 }
  0x57   :  { %p243_p4 = scmp.ne.s32.totalorder %s331_s18, %s242_s12  ;;  %p248_p6 = scmp.lt.s32.totalorder %s242_s12, %s242_s12 }
  0x59   :  { %p249_p7 = por %p248_p6, %p247_p5 }
  0x5b   :  { %p250_p8 = pnand %p249_p7, %p243_p4 }
  0x5d   :  { %253 = shalt.err (!%p250_p8)
}
  0x5e   :  { %s254_s1 = scalar_lea.hbm %s383_s4, 128 }
  0x5f   :  { %p255_p9 = scmp.ne.s32.totalorder %s383_s4, %s254_s1  ;;  %p258_p10 = scmp.lt.u32.totalorder %s254_s1, %s383_s4 }
  0x61   :  { %p260_p11 = pnand %p258_p10, %p255_p9 }
  0x63   :  { %263 = shalt.err (!%p260_p11)
}
  0x64   :  { %128 = dma.vmem_to_hbm [thread:$0]  %s331_s18, 128, %s383_s4, [#allocation9]  }
  0x65   :  { %268 = dma.done.wait [#allocation4], 128  }
  0x66   :  { %269 = vsyncadd [#allocation4], 4294967168 }
  0x67   :  { %270 = dma.done.wait [#allocation9], 256  }
  0x68   :  { %271 = vsyncadd [#allocation9], 4294967040 }
  0x69   :  { %138 = vsyncpa [#allocation3], 1 }
  0x6a   :  { %139 = vsyncpa [#allocation6], 1 }
  0x6b   :  { %140 = vsyncpa [#allocation4], 1 }
  0x6c   :  { %141 = vsyncpa [#allocation9], 1 }

</bundles_post_ra>
